<compile_context>
chip_gen: v6e
topology: v6e:2x2x1
jax: 0.10.0
libtpu: 0.0.40
codegen_flags: <defaults>
</compile_context>

<pallas_src>
import math

import jax
import jax.numpy as jnp
from jax import lax
from jax.experimental import pallas as pl
from jax.experimental.pallas import tpu as pltpu


def _round_up(n, m):
    return ((n + m - 1) // m) * m


def _make_dqn_kernel(tc, n_chunks, compute_dtype):
    """Kernel factory. `tc` (lane sub-tile) and `n_chunks` are static ints."""

    def kernel(x_ref, w1_ref, b1_ref, w2_ref, b2_ref, w3_ref, b3_ref, out_ref):
        cdt = compute_dtype

        # Weights/biases are tiny (~21 KB) -> load once, reuse across chunks.
        w1 = w1_ref[...]
        w2 = w2_ref[...]
        w3 = w3_ref[...]
        b1 = b1_ref[...]          # [H, 1], epilogue dtype
        b2 = b2_ref[...]          # [H, 1], epilogue dtype
        b3 = b3_ref[...]          # [8, 1], f32
        edt = b1.dtype

        # Contract W's in_features with the x tile's state_dim: the batch ends
        # up on lanes inside VMEM, no separate XLA transpose pass over HBM.
        dn = (((1,), (1,)), ((), ()))

        def chunk(start):
            xc = x_ref[pl.ds(start, tc), :].astype(cdt)            # [tc, S]

            # fc1 + relu  (f32 MXU accumulation, epilogue in edt)
            h1 = lax.dot_general(w1, xc, dn,
                                 preferred_element_type=jnp.float32)  # [H, tc]
            h1 = jnp.maximum(h1.astype(edt) + b1, 0.0).astype(cdt)

            # fc2 + relu
            h2 = jnp.dot(w2, h1, preferred_element_type=jnp.float32)   # [H, tc]
            h2 = jnp.maximum(h2.astype(edt) + b2, 0.0).astype(cdt)

            # fc3 (no activation); final bias add kept in f32 for accuracy.
            o = jnp.dot(w3, h2, preferred_element_type=jnp.float32) + b3  # [8, tc]
            out_ref[:, pl.ds(start, tc)] = o.astype(out_ref.dtype)

        if n_chunks == 1:
            chunk(0)
        else:
            # Short, fixed trip count: unroll so the LLO scheduler sees it and
            # the [H, tc] intermediates have short live ranges (no big spills).
            def body(c, carry):
                chunk(pl.multiple_of(c * tc, tc))
                return carry

            lax.fori_loop(0, n_chunks, body, 0, unroll=True)

    return kernel


def dqn_forward(x, params, *, block_batch=4096, inner_block=512,
                compute_dtype=jnp.float32, epilogue_dtype=None,
                feature_major_out=False):
    """DQN forward pass.

    x: [batch, state_dim] (PyTorch layout).  Returns [batch, action_dim] f32
    (or [action_dim, batch] feature-major if feature_major_out=True).

    params: PyTorch-layout weights wN [out, in], biases bN [out, 1] (f32).
    compute_dtype : MXU operand dtype. bfloat16 is recommended on v5e/v6e/v7x
                    (all have bf16-native MXUs); accumulation is always f32.
    epilogue_dtype: dtype of the bias-add/ReLU epilogue. Defaults to
                    compute_dtype; use jnp.float32 on v5e (no bf16 VPU),
                    bfloat16 on v6e/v7x (halves epilogue VALU work).
    """
    w1, b1 = params["w1"], params["b1"]
    w2, b2 = params["w2"], params["b2"]
    w3, b3 = params["w3"], params["b3"]
    if epilogue_dtype is None:
        epilogue_dtype = compute_dtype

    batch, state_dim = x.shape
    hidden = w1.shape[0]
    action_dim = w3.shape[0]
    out_rows = _round_up(action_dim, 8)        # full sublanes -> unmasked stores

    # ---- batch (lane) tile: multiple of 128, large, and >= 2 grid steps ----
    tb = _round_up(min(block_batch, batch), 128)
    if batch > 128:
        # Guarantee at least 2 grid steps so v7x's two TensorCores both get
        # work and the x/out DMAs pipeline against compute on all generations.
        tb = min(tb, _round_up(pl.cdiv(batch, 2), 128))
    padded = _round_up(batch, tb)
    grid = (padded // tb,)

    # In-kernel lane sub-tile (largest divisor of tb that is <= inner_block).
    tc = min(_round_up(inner_block, 128), tb)
    while tb % tc:
        tc -= 128
    n_chunks = tb // tc

    # ---- host-side prep: tiny weight casts/pads only.  x is NOT transposed
    #      or cast on the host; the batch pad is a no-op whenever batch % tb
    #      == 0 (the common replay-buffer case). ----
    x_in = x if padded == batch else jnp.pad(x, ((0, padded - batch), (0, 0)))

    w1c = w1.astype(compute_dtype)
    w2c = w2.astype(compute_dtype)
    w3c = jnp.pad(w3, ((0, out_rows - action_dim), (0, 0))).astype(compute_dtype)
    b1c = b1.astype(epilogue_dtype)
    b2c = b2.astype(epilogue_dtype)
    b3c = jnp.pad(b3, ((0, out_rows - action_dim), (0, 0))).astype(jnp.float32)

    kernel = _make_dqn_kernel(tc, n_chunks, compute_dtype)

    out_fm = pl.pallas_call(
        kernel,
        out_shape=jax.ShapeDtypeStruct((out_rows, padded), jnp.float32),
        grid=grid,
        in_specs=[
            # Activations: batch-major tiles straight from HBM (no relayout).
            pl.BlockSpec((tb, state_dim), lambda i: (i, 0)),
            # Weights/biases: constant block index -> stay resident in VMEM.
            pl.BlockSpec((hidden, state_dim), lambda i: (0, 0)),
            pl.BlockSpec((hidden, 1), lambda i: (0, 0)),
            pl.BlockSpec((hidden, hidden), lambda i: (0, 0)),
            pl.BlockSpec((hidden, 1), lambda i: (0, 0)),
            pl.BlockSpec((out_rows, hidden), lambda i: (0, 0)),
            pl.BlockSpec((out_rows, 1), lambda i: (0, 0)),
        ],
        # Lane-dense output tile (batch on lanes, 8 full sublanes).
        out_specs=pl.BlockSpec((out_rows, tb), lambda i: (0, i)),
        compiler_params=pltpu.CompilerParams(dimension_semantics=("parallel",)),
    )(x_in, w1c, b1c, w2c, b2c, w3c, b3c)

    if feature_major_out:
        return out_fm[:action_dim, :batch]          # [action_dim, batch]
    # Back to PyTorch layout; this touches only batch*out_rows f32 (tiny).
    return out_fm[:action_dim, :batch].T            # [batch, action_dim]


def init_dqn_params(key, state_dim, action_dim, hidden=64):
    """Synthetic init matching nn.Linear: W [out, in], b [out] (stored [out, 1])."""
    k1, k2, k3, k4, k5, k6 = jax.random.split(key, 6)

    def linear(kw, kb, fan_in, fan_out):
        bound = 1.0 / math.sqrt(fan_in)
        w = jax.random.uniform(kw, (fan_out, fan_in), jnp.float32, -bound, bound)
        b = jax.random.uniform(kb, (fan_out, 1), jnp.float32, -bound, bound)
        return w, b

    w1, b1 = linear(k1, k2, state_dim, hidden)
    w2, b2 = linear(k3, k4, hidden, hidden)
    w3, b3 = linear(k5, k6, hidden, action_dim)
    return {"w1": w1, "b1": b1, "w2": w2, "b2": b2, "w3": w3, "b3": b3}


def dqn_reference(x, p):
    h1 = jnp.maximum(x @ p["w1"].T + p["b1"].T, 0.0)
    h2 = jnp.maximum(h1 @ p["w2"].T + p["b2"].T, 0.0)
    return h2 @ p["w3"].T + p["b3"].T


if __name__ == "__main__":
    key = jax.random.PRNGKey(0)
    k_params, k1, k2, k3 = jax.random.split(key, 4)

    state_dim, action_dim, hidden = 16, 4, 64
    params = init_dqn_params(k_params, state_dim, action_dim, hidden=hidden)

    # 1) Small online-inference batch, full f32 path (tight tolerance).
    x_small = jax.random.normal(k1, (8, state_dim), dtype=jnp.float32)
    out_small = jax.block_until_ready(dqn_forward(x_small, params))
    ref_small = dqn_reference(x_small, params)
    assert out_small.shape == (8, action_dim), out_small.shape
    assert jnp.allclose(out_small, ref_small, atol=1e-4, rtol=1e-4), "f32 mismatch"

    # 2) Ragged replay batch (500 -> tb=256, 2 grid steps), bf16 MXU operands
    #    + bf16 epilogue (v6e/v7x config).
    x_mid = jax.random.normal(k2, (500, state_dim), dtype=jnp.float32)
    out_mid = jax.block_until_ready(
        dqn_forward(x_mid, params, compute_dtype=jnp.bfloat16))
    ref_mid = dqn_reference(x_mid, params)
    assert out_mid.shape == (500, action_dim), out_mid.shape
    assert jnp.allclose(out_mid, ref_mid, atol=5e-2, rtol=5e-2), "bf16 mismatch"

    # 3) Larger batch exercising the in-kernel lane sub-tiling (tb=1024,
    #    2 chunks/step), bf16 MXU operands + f32 epilogue (v5e config).
    x_big = jax.random.normal(k3, (2048, state_dim), dtype=jnp.float32)
    out_big = jax.block_until_ready(
        dqn_forward(x_big, params, compute_dtype=jnp.bfloat16,
                    epilogue_dtype=jnp.float32))
    ref_big = dqn_reference(x_big, params)
    assert out_big.shape == (2048, action_dim), out_big.shape
    assert jnp.allclose(out_big, ref_big, atol=5e-2, rtol=5e-2), "bf16/f32 mismatch"

    print("KERNEL_OK")
</pallas_src>

<mosaic_0001>
module attributes {stable_mosaic.version = 11 : i64} {
  func.func @kernel(%arg0: i32, %arg1: memref<128x16xf32, #tpu.memory_space<vmem>>, %arg2: memref<64x16xf32, #tpu.memory_space<vmem>>, %arg3: memref<64x1xf32, #tpu.memory_space<vmem>>, %arg4: memref<64x64xf32, #tpu.memory_space<vmem>>, %arg5: memref<64x1xf32, #tpu.memory_space<vmem>>, %arg6: memref<8x64xf32, #tpu.memory_space<vmem>>, %arg7: memref<8x1xf32, #tpu.memory_space<vmem>>, %arg8: memref<8x128xf32, #tpu.memory_space<vmem>>) attributes {dimension_semantics = [#tpu.dimension_semantics<parallel>], iteration_bounds = array<i64: 1>, scalar_prefetch = 0 : i64, scratch_operands = 0 : i64, tpu.core_type = #tpu.core_type<tc>, window_params = [{transform_indices = @transform_0, window_bounds = array<i64: 128, 16>}, {pipeline_mode = #tpu.pipeline_mode<synchronous>, transform_indices = @transform_1, window_bounds = array<i64: 64, 16>}, {pipeline_mode = #tpu.pipeline_mode<synchronous>, transform_indices = @transform_2, window_bounds = array<i64: 64, 1>}, {pipeline_mode = #tpu.pipeline_mode<synchronous>, transform_indices = @transform_3, window_bounds = array<i64: 64, 64>}, {pipeline_mode = #tpu.pipeline_mode<synchronous>, transform_indices = @transform_4, window_bounds = array<i64: 64, 1>}, {pipeline_mode = #tpu.pipeline_mode<synchronous>, transform_indices = @transform_5, window_bounds = array<i64: 8, 64>}, {pipeline_mode = #tpu.pipeline_mode<synchronous>, transform_indices = @transform_6, window_bounds = array<i64: 8, 1>}, {transform_indices = @transform_7, window_bounds = array<i64: 8, 128>}]} {
    %c0 = arith.constant 0 : index
    %c0_0 = arith.constant 0 : index
    %0 = vector.load %arg2[%c0, %c0_0] : memref<64x16xf32, #tpu.memory_space<vmem>>, vector<64x16xf32>
    %c0_1 = arith.constant 0 : index
    %c0_2 = arith.constant 0 : index
    %1 = vector.load %arg4[%c0_1, %c0_2] : memref<64x64xf32, #tpu.memory_space<vmem>>, vector<64x64xf32>
    %c0_3 = arith.constant 0 : index
    %c0_4 = arith.constant 0 : index
    %2 = vector.load %arg6[%c0_3, %c0_4] : memref<8x64xf32, #tpu.memory_space<vmem>>, vector<8x64xf32>
    %c0_5 = arith.constant 0 : index
    %c0_6 = arith.constant 0 : index
    %3 = vector.load %arg3[%c0_5, %c0_6] : memref<64x1xf32, #tpu.memory_space<vmem>>, vector<64x1xf32>
    %c0_7 = arith.constant 0 : index
    %c0_8 = arith.constant 0 : index
    %4 = vector.load %arg5[%c0_7, %c0_8] : memref<64x1xf32, #tpu.memory_space<vmem>>, vector<64x1xf32>
    %c0_9 = arith.constant 0 : index
    %c0_10 = arith.constant 0 : index
    %5 = vector.load %arg7[%c0_9, %c0_10] : memref<8x1xf32, #tpu.memory_space<vmem>>, vector<8x1xf32>
    %c0_11 = arith.constant 0 : index
    %c0_12 = arith.constant 0 : index
    %6 = vector.load %arg1[%c0_11, %c0_12] : memref<128x16xf32, #tpu.memory_space<vmem>>, vector<128x16xf32>
    %cst = arith.constant dense<0.000000e+00> : vector<64x128xf32>
    %7 = tpu.matmul %0, %6, %cst {dimension_numbers = #tpu.dot_dimension_numbers<[1], [1], [0], [0], [0, 0, 1, 0], [], []>} : vector<64x16xf32>, vector<128x16xf32>, vector<64x128xf32> -> vector<64x128xf32>
    %8 = vector.broadcast %3 : vector<64x1xf32> to vector<64x128xf32>
    %9 = arith.addf %7, %8 : vector<64x128xf32>
    %cst_13 = arith.constant 0.000000e+00 : f32
    %10 = vector.broadcast %cst_13 : f32 to vector<64x128xf32>
    %11 = arith.maximumf %9, %10 : vector<64x128xf32>
    %cst_14 = arith.constant dense<0.000000e+00> : vector<64x128xf32>
    %12 = tpu.matmul %1, %11, %cst_14 {dimension_numbers = #tpu.dot_dimension_numbers<[1], [0], [0], [1], [0, 0, 1, 1], [], []>} : vector<64x64xf32>, vector<64x128xf32>, vector<64x128xf32> -> vector<64x128xf32>
    %13 = vector.broadcast %4 : vector<64x1xf32> to vector<64x128xf32>
    %14 = arith.addf %12, %13 : vector<64x128xf32>
    %cst_15 = arith.constant 0.000000e+00 : f32
    %15 = vector.broadcast %cst_15 : f32 to vector<64x128xf32>
    %16 = arith.maximumf %14, %15 : vector<64x128xf32>
    %cst_16 = arith.constant dense<0.000000e+00> : vector<8x128xf32>
    %17 = tpu.matmul %2, %16, %cst_16 {dimension_numbers = #tpu.dot_dimension_numbers<[1], [0], [0], [1], [0, 0, 1, 1], [], []>} : vector<8x64xf32>, vector<64x128xf32>, vector<8x128xf32> -> vector<8x128xf32>
    %18 = vector.broadcast %5 : vector<8x1xf32> to vector<8x128xf32>
    %19 = arith.addf %17, %18 : vector<8x128xf32>
    %c0_17 = arith.constant 0 : index
    %c0_18 = arith.constant 0 : index
    %20 = vector.load %arg8[%c0_17, %c0_18] : memref<8x128xf32, #tpu.memory_space<vmem>>, vector<8x128xf32>
    tpu.vector_store %arg8[%c0_17, %c0_18], %19 {strides = array<i32>} : memref<8x128xf32, #tpu.memory_space<vmem>>, vector<8x128xf32>,
    return
  }
  func.func @transform_0(%arg0: i32) -> (i32, i32) {
    %c0_i32 = arith.constant 0 : i32
    %c0_i32_0 = arith.constant 0 : i32
    return %arg0, %c0_i32 : i32, i32
  }
  func.func @transform_1(%arg0: i32) -> (i32, i32) {
    %c0_i32 = arith.constant 0 : i32
    %c0_i32_0 = arith.constant 0 : i32
    %c0_i32_1 = arith.constant 0 : i32
    return %c0_i32, %c0_i32_0 : i32, i32
  }
  func.func @transform_2(%arg0: i32) -> (i32, i32) {
    %c0_i32 = arith.constant 0 : i32
    %c0_i32_0 = arith.constant 0 : i32
    %c0_i32_1 = arith.constant 0 : i32
    return %c0_i32, %c0_i32_0 : i32, i32
  }
  func.func @transform_3(%arg0: i32) -> (i32, i32) {
    %c0_i32 = arith.constant 0 : i32
    %c0_i32_0 = arith.constant 0 : i32
    %c0_i32_1 = arith.constant 0 : i32
    return %c0_i32, %c0_i32_0 : i32, i32
  }
  func.func @transform_4(%arg0: i32) -> (i32, i32) {
    %c0_i32 = arith.constant 0 : i32
    %c0_i32_0 = arith.constant 0 : i32
    %c0_i32_1 = arith.constant 0 : i32
    return %c0_i32, %c0_i32_0 : i32, i32
  }
  func.func @transform_5(%arg0: i32) -> (i32, i32) {
    %c0_i32 = arith.constant 0 : i32
    %c0_i32_0 = arith.constant 0 : i32
    %c0_i32_1 = arith.constant 0 : i32
    return %c0_i32, %c0_i32_0 : i32, i32
  }
  func.func @transform_6(%arg0: i32) -> (i32, i32) {
    %c0_i32 = arith.constant 0 : i32
    %c0_i32_0 = arith.constant 0 : i32
    %c0_i32_1 = arith.constant 0 : i32
    return %c0_i32, %c0_i32_0 : i32, i32
  }
  func.func @transform_7(%arg0: i32) -> (i32, i32) {
    %c0_i32 = arith.constant 0 : i32
    %c0_i32_0 = arith.constant 0 : i32
    return %c0_i32, %arg0 : i32, i32
  }
}

</mosaic_0001>

<bundles_post_ra>
// kernel: tpu_custom_call.1
= control target key start
LH: loop header
LB: loop body
LE: loop exit
PB: predicated region body
PF: predicated region fallthrough
CT: control target
= control target key end

     0   :  { %vm117_vm0 = vcmask 130048   ;;  %v775_v2 = vmov 0   ;;  %s1021_s0 = inlined_call_operand.vmem [shape: f32[128,16], index: 0, kind: input, shape index: {}]   ;;  %s1022_s1 = inlined_call_operand.vmem [shape: f32[64,16], index: 1, kind: input, shape index: {}]   ;;  %s1023_s2 = inlined_call_operand.vmem [shape: f32[64,1], index: 2, kind: input, shape index: {}]   ;;  %s1024_s3 = inlined_call_operand.vmem [shape: f32[64,64], index: 3, kind: input, shape index: {}]   ;;  %s1025_s4 = inlined_call_operand.vmem [shape: f32[64,1], index: 4, kind: input, shape index: {}]   ;;  %s1026_s5 = inlined_call_operand.vmem [shape: f32[8,64], index: 5, kind: input, shape index: {}]   ;;  %s1027_s6 = inlined_call_operand.vmem [shape: f32[8,1], index: 6, kind: input, shape index: {}]   ;;  %s1028_s7 = inlined_call_operand.hbm [shape: f32[8,128], index: 7, kind: output, shape index: {}]  }
   0x1   :  { %v76_v0 = vld [vmem:[%s1021_s0 + $0x78] sm:$0xff]  ;;  %v75_v1 = vld [vmem:[%s1021_s0 + $0x70] sm:$0xff]  ;;  %751 = vset.pattern.permute.xlu0 %v775_v2  ;;  %752 = vset.pattern.permute.xlu1 %v775_v2  ;;  %v74_v3 = vld [vmem:[%s1021_s0 + $0x68] sm:$0xff] }
   0x2   :  { %656 = vmatprep.subr.msk.mxu0 %vm117_vm0, %v76_v0  ;;  %v27_v4 = vld [vmem:[%s1022_s1] sm:$0xff]  ;;  %v51_v6 = vld [vmem:[%s1023_s2 + $0x38] sm:$0xff]  ;;  %v49_v7 = vld [vmem:[%s1023_s2 + $0x28] sm:$0xff] }
   0x3   :  { %657 = vmatpush3.xpose.msk.msra.mxu0 %vm117_vm0, %v76_v0  ;;  %688 = vmatprep.mubr.msk.f32.mxu0 %vm117_vm0, %v27_v4  ;;  %v73_v5 = vld [vmem:[%s1021_s0 + $0x60] sm:$0xff]  ;;  %v50_v8 = vld [vmem:[%s1023_s2 + $0x30] sm:$0xff]  ;;  %v72_v10 = vld [vmem:[%s1021_s0 + $0x58] sm:$0xff] }
   0x4   :  { %658 = vmatprep.subr.msk.mxu0 %vm117_vm0, %v75_v1  ;;  %114 = vperm.xlu0 %751, %v51_v6   ;;  %v48_v9 = vld [vmem:[%s1023_s2 + $0x20] sm:$0xff] }
   0x5   :  { %104 = vperm.xlu1 %752, %v49_v7  }
   0x7   :  { %659 = vmatpush3.xpose.msk.msra.mxu0 %vm117_vm0, %v75_v1 }
   0x8   :  { %660 = vmatprep.subr.msk.mxu0 %vm117_vm0, %v74_v3  ;;  %109 = vperm.xlu0 %751, %v50_v8  }
   0x9   :  { %99 = vperm.xlu1 %752, %v48_v9  }
   0xb   :  { %661 = vmatpush3.xpose.msk.msra.mxu0 %vm117_vm0, %v74_v3 }
   0xc   :  { %662 = vmatprep.subr.msk.mxu0 %vm117_vm0, %v73_v5 }
   0xd   :  { %12 = vsyncpa [#allocation3], 0  ;;  %v47_v11 = vld [vmem:[%s1023_s2 + $0x18] sm:$0xff]  ;;  %v46_v12 = vld [vmem:[%s1023_s2 + $0x10] sm:$0xff]  ;;  %vm343_vm1 = vcmask 523264   ;;  %vm777_vm2 = vmmov 0  }
   0xe   :  { %v71_v13 = vld [vmem:[%s1021_s0 + $0x50] sm:$0xff]  ;;  %94 = vperm.xlu0 %751, %v47_v11   ;;  %89 = vperm.xlu1 %752, %v46_v12   ;;  %v45_v14 = vld [vmem:[%s1023_s2 + $0x8] sm:$0xff]  ;;  %v44_v15 = vld [vmem:[%s1023_s2] sm:$0xff]  ;;  %s778_s22 = smov [#allocation2]  }
   0xf   :  { %663 = vmatpush3.xpose.msk.msra.mxu0 %vm117_vm0, %v73_v5  ;;  %v70_v16 = vld [vmem:[%s1021_s0 + $0x48] sm:$0xff]  ;;  %v59_v17 = vld [vmem:[%s1025_s4 + $0x38] sm:$0xff]  ;;  %v58_v18 = vld [vmem:[%s1025_s4 + $0x30] sm:$0xff]  ;;  %s566_s23 = sshll.u32 %s778_s22, 4  ;;  %s567_s23 = int_to_ptr.vmem [resolvable:$true] %s566_s23 }
  0x10   :  { %664 = vmatprep.subr.msk.mxu0 %vm117_vm0, %v72_v10  ;;  %v69_v19 = vld [vmem:[%s1021_s0 + $0x40] sm:$0xff]  ;;  %v57_v20 = vld [vmem:[%s1025_s4 + $0x28] sm:$0xff]  ;;  %v68_v22 = vld [vmem:[%s1021_s0 + $0x38] sm:$0xff]  ;;  %p758_p1 = scmp.lt.s32.totalorder %s567_s23, %s567_s23 }
  0x11   :  { %v56_v21 = vld [vmem:[%s1025_s4 + $0x20] sm:$0xff]  ;;  %v55_v23 = vld [vmem:[%s1025_s4 + $0x18] sm:$0xff]  ;;  %v54_v24 = vld [vmem:[%s1025_s4 + $0x10] sm:$0xff] }
  0x12   :  { %84 = vperm.xlu0 %751, %v45_v14   ;;  %79 = vperm.xlu1 %752, %v44_v15   ;;  %v67_v25 = vld [vmem:[%s1021_s0 + $0x30] sm:$0xff]  ;;  %v53_v26 = vld [vmem:[%s1025_s4 + $0x8] sm:$0xff]  ;;  %v52_v27 = vld [vmem:[%s1025_s4] sm:$0xff] }
  0x13   :  { %665 = vmatpush3.xpose.msk.msra.mxu0 %vm117_vm0, %v72_v10  ;;  %v66_v28 = vld [vmem:[%s1021_s0 + $0x28] sm:$0xff]  ;;  %v60_v29 = vld [vmem:[%s1027_s6] sm:$0xff]  ;;  %v64_v31 = vld [vmem:[%s1021_s0 + $0x18] sm:$0xff] }
  0x14   :  { %666 = vmatprep.subr.msk.mxu0 %vm117_vm0, %v71_v13  ;;  %v65_v30 = vld [vmem:[%s1021_s0 + $0x20] sm:$0xff]  ;;  %v63_v32 = vld [vmem:[%s1021_s0 + $0x10] sm:$0xff]  ;;  %v62_v33 = vld [vmem:[%s1021_s0 + $0x8] sm:$0xff] }
  0x15   :  { %v61_v34 = vld [vmem:[%s1021_s0] sm:$0xff]  ;;  %v28_v35 = vld [vmem:[%s1022_s1 + $0x8] sm:$0xff]  ;;  %v29_v36 = vld [vmem:[%s1022_s1 + $0x10] sm:$0xff]  ;;  %s753_s0 = scalar_lea.vmem %s567_s23, 128 }
  0x16   :  { %340 = vperm.xlu0 %751, %v59_v17   ;;  %335 = vperm.xlu1 %752, %v58_v18   ;;  %v30_v37 = vld [vmem:[%s1022_s1 + $0x18] sm:$0xff]  ;;  %v31_v38 = vld [vmem:[%s1022_s1 + $0x20] sm:$0xff]  ;;  %v32_v39 = vld [vmem:[%s1022_s1 + $0x28] sm:$0xff]  ;;  %v776_v18 = vmov 0.0   ;;  %p754_p0 = scmp.ne.s32.totalorder %s567_s23, %s753_s0  ;;  %p759_p2 = scmp.lt.s32.totalorder %s753_s0, %s753_s0 }
  0x17   :  { %667 = vmatpush3.xpose.msk.msra.mxu0 %vm117_vm0, %v71_v13  ;;  %v33_v40 = vld [vmem:[%s1022_s1 + $0x30] sm:$0xff]  ;;  %v34_v41 = vld [vmem:[%s1022_s1 + $0x38] sm:$0xff]  ;;  %v35_v42 = vld [vmem:[%s1024_s3] sm:$0xff] }
  0x18   :  { %668 = vmatprep.subr.msk.mxu0 %vm117_vm0, %v70_v16  ;;  %716 = vmatprep.mubr.msk.f32.mxu1 %vm343_vm1, %v35_v42  ;;  %v36_v11 = vld [vmem:[%s1024_s3 + $0x8] sm:$0xff]  ;;  %v37_v12 = vld [vmem:[%s1024_s3 + $0x10] sm:$0xff]  ;;  %v38_v13 = vld [vmem:[%s1024_s3 + $0x18] sm:$0xff]  ;;  %p760_p3 = por %p759_p2, %p758_p1 }
  0x19   :  { %v39_v14 = vld [vmem:[%s1024_s3 + $0x20] sm:$0xff]  ;;  %v40_v15 = vld [vmem:[%s1024_s3 + $0x28] sm:$0xff]  ;;  %v42_v17 = vld [vmem:[%s1024_s3 + $0x38] sm:$0xff] }
  0x1a   :  { %330 = vperm.xlu0 %751, %v57_v20   ;;  %325 = vperm.xlu1 %752, %v56_v21   ;;  %p761_p4 = pnand %p760_p3, %p754_p0 }
  0x1b   :  { %669 = vmatpush3.xpose.msk.msra.mxu0 %vm117_vm0, %v70_v16  ;;  %v41_v16 = vld [vmem:[%s1024_s3 + $0x30] sm:$0xff] }
  0x1c   :  { %670 = vmatprep.subr.msk.mxu0 %vm117_vm0, %v69_v19 }
  0x1e   :  { %320 = vperm.xlu0 %751, %v55_v23   ;;  %315 = vperm.xlu1 %752, %v54_v24  }
  0x1f   :  { %671 = vmatpush3.xpose.msk.msra.mxu0 %vm117_vm0, %v69_v19 }
  0x20   :  { %672 = vmatprep.subr.msk.mxu0 %vm117_vm0, %v68_v22 }
  0x22   :  { %310 = vperm.xlu0 %751, %v53_v26   ;;  %305 = vperm.xlu1 %752, %v52_v27  }
  0x23   :  { %673 = vmatpush3.xpose.msk.msra.mxu0 %vm117_vm0, %v68_v22 }
  0x24   :  { %674 = vmatprep.subr.msk.mxu0 %vm117_vm0, %v67_v25 }
  0x26   :  { %483 = vperm.xlu0 %751, %v60_v29  }
  0x27   :  { %675 = vmatpush3.xpose.msk.msra.mxu0 %vm117_vm0, %v67_v25 }
  0x28   :  { %676 = vmatprep.subr.msk.mxu0 %vm117_vm0, %v66_v28 }
  0x2b   :  { %677 = vmatpush3.xpose.msk.msra.mxu0 %vm117_vm0, %v66_v28 }
  0x2c   :  { %678 = vmatprep.subr.msk.mxu0 %vm117_vm0, %v65_v30 }
  0x2f   :  { %679 = vmatpush3.xpose.msk.msra.mxu0 %vm117_vm0, %v65_v30 }
  0x30   :  { %680 = vmatprep.subr.msk.mxu0 %vm117_vm0, %v64_v31 }
  0x33   :  { %681 = vmatpush3.xpose.msk.msra.mxu0 %vm117_vm0, %v64_v31 }
  0x34   :  { %682 = vmatprep.subr.msk.mxu0 %vm117_vm0, %v63_v32 }
  0x37   :  { %683 = vmatpush3.xpose.msk.msra.mxu0 %vm117_vm0, %v63_v32 }
  0x38   :  { %684 = vmatprep.subr.msk.mxu0 %vm117_vm0, %v62_v33 }
  0x3b   :  { %685 = vmatpush3.xpose.msk.msra.mxu0 %vm117_vm0, %v62_v33 }
  0x3c   :  { %686 = vmatprep.subr.msk.mxu0 %vm117_vm0, %v61_v34 }
  0x3f   :  { %687 = vmatpush3.xpose.msk.msra.mxu0 %vm117_vm0, %v61_v34 }
  0x42   :  { %689 = vmatmul.mubr.msk.f32.vlgmr.msra.gmra.mxu0 %vm117_vm0, %v28_v35 }
  0x43   :  { %691 = vmatprep.mubr.msk.f32.mxu0 %vm117_vm0, %v29_v36 }
  0x46   :  { %692 = vmatmul.mubr.msk.f32.gmra.mxu0 %vm117_vm0, %v30_v37 }
  0x47   :  { %694 = vmatprep.mubr.msk.f32.mxu0 %vm117_vm0, %v31_v38 }
  0x4a   :  { %695 = vmatmul.mubr.msk.f32.gmra.mxu0 %vm117_vm0, %v32_v39 }
  0x4b   :  { %697 = vmatprep.mubr.msk.f32.mxu0 %vm117_vm0, %v33_v40 }
  0x4e   :  { %698 = vmatmul.mubr.msk.f32.gmra.mxu0 %vm117_vm0, %v34_v41 }
  0x7f   :  { %v115_v45 = vpop.permute.xlu0 %114 }
  0x80   :  { %v105_v47 = vpop.permute.xlu1 %104 }
  0x83   :  { %v110_v50 = vpop.permute.xlu0 %109 }
  0x84   :  { %v100_v52 = vpop.permute.xlu1 %99 }
  0x89   :  { %v95_v59 = vpop.permute.xlu0 %94  ;;  %v90_v62 = vpop.permute.xlu1 %89 }
  0x8d   :  { %v85_v3 = vpop.permute.xlu0 %84  ;;  %v80_v6 = vpop.permute.xlu1 %79 }
  0x91   :  { %v341_v21 = vpop.permute.xlu0 %340  ;;  %v336_v23 = vpop.permute.xlu1 %335 }
  0x95   :  { %v331_v26 = vpop.permute.xlu0 %330  ;;  %v326_v28 = vpop.permute.xlu1 %325 }
  0x99   :  { %v321_v35 = vpop.permute.xlu0 %320  ;;  %v316_v38 = vpop.permute.xlu1 %315 }
 0x102   :  { %v690_v43 = vpop.f32.mrf.mxu0 }
 0x103   :  { %v262_v4 = vadd.f32 %v690_v43, %v85_v3  ;;  %v311_v43 = vpop.permute.xlu0 %310 }
 0x104   :  { %v256_v44 = vpop.f32.mrf.mxu0 }
 0x105   :  { %v257_v7 = vadd.f32 %v256_v44, %v80_v6  ;;  %v296_v9 = vmax.f32 %v262_v4, 0.0 }
 0x106   :  { %v693_v46 = vpop.f32.mrf.mxu0 }
 0x107   :  { %v272_v63 = vadd.f32 %v693_v46, %v95_v59  ;;  %v295_v10 = vmax.f32 %v257_v7, 0.0  ;;  %v306_v46 = vpop.permute.xlu1 %305 }
 0x108   :  { %v266_v48 = vpop.f32.mrf.mxu0 }
 0x109   :  { %v267_v1 = vadd.f32 %v266_v48, %v90_v62  ;;  %v298_v5 = vmax.f32 %v272_v63, 0.0 }
 0x10a   :  { %v696_v49 = vpop.f32.mrf.mxu0 }
 0x10b   :  { %v282_v56 = vadd.f32 %v696_v49, %v105_v47  ;;  %v297_v8 = vmax.f32 %v267_v1, 0.0 }
 0x10c   :  { %v276_v51 = vpop.f32.mrf.mxu0 }
 0x10d   :  { %v277_v60 = vadd.f32 %v276_v51, %v100_v52  ;;  %v300_v0 = vmax.f32 %v282_v56, 0.0  ;;  %v43_v51 = vld [vmem:[%s1026_s5] sm:$0xff]  ;;  %v484_v52 = vpop.permute.xlu0 %483 }
 0x10e   :  { %v699_v53 = vpop.f32.mrf.mxu0 }
 0x10f   :  { %v292_v54 = vadd.f32 %v699_v53, %v115_v45  ;;  %v299_v2 = vmax.f32 %v277_v60, 0.0 }
 0x110   :  { %v286_v55 = vpop.f32.mrf.mxu0 }
 0x111   :  { %v302_v57 = vmax.f32 %v292_v54, 0.0  ;;  %v287_v58 = vadd.f32 %v286_v55, %v110_v50 }
 0x113   :  { %v301_v61 = vmax.f32 %v287_v58, 0.0  ;;  %700 = vmatprep.subr.mxu1 %v302_v57 }
 0x114   :  { %701 = vmatpush3.msra.mxu1 %v302_v57 }
 0x115   :  { %702 = vmatprep.subr.mxu1 %v301_v61 }
 0x116   :  { %703 = vmatpush3.msra.mxu1 %v301_v61 }
 0x117   :  { %704 = vmatprep.subr.mxu1 %v300_v0 }
 0x118   :  { %705 = vmatpush3.msra.mxu1 %v300_v0 }
 0x119   :  { %706 = vmatprep.subr.mxu1 %v299_v2 }
 0x11a   :  { %707 = vmatpush3.msra.mxu1 %v299_v2 }
 0x11b   :  { %708 = vmatprep.subr.mxu1 %v298_v5 }
 0x11c   :  { %709 = vmatpush3.msra.mxu1 %v298_v5 }
 0x11d   :  { %710 = vmatprep.subr.mxu1 %v297_v8 }
 0x11e   :  { %711 = vmatpush3.msra.mxu1 %v297_v8 }
 0x11f   :  { %712 = vmatprep.subr.mxu1 %v296_v9 }
 0x120   :  { %713 = vmatpush3.msra.mxu1 %v296_v9 }
 0x121   :  { %714 = vmatprep.subr.mxu1 %v295_v10 }
 0x122   :  { %715 = vmatpush3.msra.mxu1 %v295_v10 }
 0x123   :  { %717 = vmatmul.mubr.msk.f32.vlgmr.msra.gmra.mxu1 %vm343_vm1, %v36_v11  ;;  %728 = vmatprep.subr.mxu1 %v776_v18 }
 0x124   :  { %719 = vmatprep.mubr.msk.f32.mxu1 %vm343_vm1, %v37_v12 }
 0x127   :  { %720 = vmatmul.mubr.msk.f32.gmra.mxu1 %vm343_vm1, %v38_v13 }
 0x128   :  { %722 = vmatprep.mubr.msk.f32.mxu1 %vm343_vm1, %v39_v14 }
 0x12b   :  { %723 = vmatmul.mubr.msk.f32.gmra.mxu1 %vm343_vm1, %v40_v15 }
 0x12c   :  { %725 = vmatprep.mubr.msk.f32.mxu1 %vm343_vm1, %v41_v16 }
 0x12f   :  { %726 = vmatmul.mubr.msk.f32.gmra.mxu1 %vm343_vm1, %v42_v17 }
 0x130   :  { %744 = vmatprep.mubr.msk.f32.mxu1 %vm777_vm2, %v776_v18 }
 0x1e3   :  { %v718_v19 = vpop.f32.mrf.mxu1 }
 0x1e4   :  { %v440_v44 = vadd.f32 %v718_v19, %v311_v43 }
 0x1e5   :  { %v434_v20 = vpop.f32.mrf.mxu1 }
 0x1e6   :  { %v435_v47 = vadd.f32 %v434_v20, %v306_v46  ;;  %v474_v49 = vmax.f32 %v440_v44, 0.0 }
 0x1e7   :  { %v721_v22 = vpop.f32.mrf.mxu1 }
 0x1e8   :  { %v450_v39 = vadd.f32 %v721_v22, %v321_v35  ;;  %v473_v50 = vmax.f32 %v435_v47, 0.0 }
 0x1e9   :  { %v444_v24 = vpop.f32.mrf.mxu1 }
 0x1ea   :  { %v445_v41 = vadd.f32 %v444_v24, %v316_v38  ;;  %v476_v45 = vmax.f32 %v450_v39, 0.0 }
 0x1eb   :  { %v724_v25 = vpop.f32.mrf.mxu1 }
 0x1ec   :  { %v460_v32 = vadd.f32 %v724_v25, %v331_v26  ;;  %v475_v48 = vmax.f32 %v445_v41, 0.0 }
 0x1ed   :  { %v454_v27 = vpop.f32.mrf.mxu1 }
 0x1ee   :  { %v455_v36 = vadd.f32 %v454_v27, %v326_v28  ;;  %v478_v40 = vmax.f32 %v460_v32, 0.0 }
 0x1ef   :  { %v727_v29 = vpop.f32.mrf.mxu1 }
 0x1f0   :  { %v470_v30 = vadd.f32 %v727_v29, %v341_v21  ;;  %v477_v42 = vmax.f32 %v455_v36, 0.0 }
 0x1f1   :  { %v464_v31 = vpop.f32.mrf.mxu1 }
 0x1f2   :  { %v480_v33 = vmax.f32 %v470_v30, 0.0  ;;  %v465_v34 = vadd.f32 %v464_v31, %v336_v23 }
 0x1f4   :  { %v479_v37 = vmax.f32 %v465_v34, 0.0  ;;  %729 = vmatpush3.msra.mxu1 %v480_v33 }
 0x1f5   :  { %730 = vmatprep.subr.mxu1 %v776_v18 }
 0x1f6   :  { %731 = vmatpush3.msra.mxu1 %v479_v37 }
 0x1f7   :  { %732 = vmatprep.subr.mxu1 %v776_v18 }
 0x1f8   :  { %733 = vmatpush3.msra.mxu1 %v478_v40 }
 0x1f9   :  { %734 = vmatprep.subr.mxu1 %v776_v18 }
 0x1fa   :  { %735 = vmatpush3.msra.mxu1 %v477_v42 }
 0x1fb   :  { %736 = vmatprep.subr.mxu1 %v776_v18 }
 0x1fc   :  { %737 = vmatpush3.msra.mxu1 %v476_v45 }
 0x1fd   :  { %738 = vmatprep.subr.mxu1 %v776_v18 }
 0x1fe   :  { %739 = vmatpush3.msra.mxu1 %v475_v48 }
 0x1ff   :  { %740 = vmatprep.subr.mxu1 %v776_v18 }
 0x200   :  { %741 = vmatpush3.msra.mxu1 %v474_v49 }
 0x201   :  { %742 = vmatprep.subr.mxu1 %v776_v18 }
 0x202   :  { %743 = vmatpush3.msra.mxu1 %v473_v50 }
 0x203   :  { %745 = vmatmul.mubr.msk.f32.vlgmr.msra.gmra.mxu1 %vm343_vm1, %v43_v51 }
 0x2c3   :  { %v555_v53 = vpop.f32.mrf.mxu1 }
 0x2c4   :  { %v556_v54 = vadd.f32 %v555_v53, %v484_v52 }
 0x2c5   :  { %v746_v55 = vpop.f32.mrf.mxu1 }
 0x2c6   :  { %559 = vst [vmem:[#allocation2] sm:$0xff] %v556_v54 }
 0x2c7   :  { %764 = shalt.err (!%p761_p4)
}
 0x2c8   :  { %569 = dma.vmem_to_hbm [thread:$0]  %s567_s23, 128, %s1028_s7, [#allocation3]  }
 0x2c9   :  { %773 = dma.done.wait [#allocation3], 128  }
 0x2ca   :  { %774 = vsyncadd [#allocation3], 4294967168 }
 0x2cb   :  { %573 = vsyncpa [#allocation3], 1 }

</bundles_post_ra>
